<compile_context>
chip_gen: v7x
topology: tpu7x:2x2x1
jax: 0.10.0
libtpu: 0.0.40
codegen_flags: <defaults>
</compile_context>

<pallas_src>
import jax
import jax.numpy as jnp
from jax.experimental import pallas as pl
from jax.experimental.pallas import tpu as pltpu


_MIN_TILE = 512     # packed rows per grid step (amortizes ~0.35 us step overhead)
_MAX_TILE = 32768   # packed rows per grid step (bound per-step latency / compile)


def _round_up(x, m):
    return (x + m - 1) // m * m


def _lane_pad(n):   # last-dim VMEM padding (128-lane groups)
    return _round_up(max(int(n), 1), 128)


def _sub_pad(n):    # second-to-last-dim VMEM padding (8 sublanes)
    return _round_up(max(int(n), 1), 8)


def _vmem_capacity_bytes():
    try:
        cap = getattr(pltpu.get_tpu_info(), "vmem_capacity_bytes", None)
        if cap:
            return int(cap)
    except Exception:
        pass
    return 64 * 1024 * 1024   # conservative fallback (v7x per-TensorCore VMEM)


def _mlp_kernel(x_ref, w1_ref, b1_ref, w2_ref, o_ref):
    # Layer 1 (MXU): (tp, p*D) @ (p*D, p*Hp) -> f32.  Block-diagonal W1 means
    # packed row r, lane group a holds the hidden activations of row r*p + a.
    h = jnp.dot(x_ref[...], w1_ref[...], preferred_element_type=jnp.float32)
    # Bias + ReLU (VPU, f32).  Padded hidden lanes have w1 == b1 == 0 -> stay 0;
    # the "bias-2" lane has w1 == 0, b1 == 1 -> stays exactly 1 after ReLU.
    h = jnp.maximum(h + b1_ref[...], 0.0)
    # Layer 2 (MXU): (tp, p*Hp) @ (p*Hp, p) block-diagonal w2 -> (tp, p).
    # Keeps the hidden reduction on the MXU instead of the 2-XLU path, and the
    # output slab (tp, p) reshapes exactly to (tp*p, 1) rows.
    o = jnp.dot(h, w2_ref[...], preferred_element_type=jnp.float32)
    o_ref[...] = o.astype(o_ref.dtype)


def score_network_scalar(x, w1, b1, w2, b2):
    """Fused MLP forward: x (B, D) -> (B, 1).  w1 (D, H), b1 (H,), w2 (H, 1), b2 (1,)."""
    B, D = x.shape
    H = w1.shape[1]
    assert w1.shape == (D, H)
    b1 = jnp.asarray(b1).reshape(H)
    w2 = jnp.asarray(w2).reshape(H)
    b2 = jnp.asarray(b2).reshape(())

    dtype = x.dtype
    itemsize = jnp.dtype(dtype).itemsize
    Hp = _round_up(H + 1, 128)                 # padded hidden (+1 lane for b2)

    # ---- row packing factor: pack p rows of x into one packed row -----------
    p = 1
    for cand in (8, 4, 2):
        if cand * D <= 128 and B % cand == 0:
            p = cand
            break
    K, N1 = p * D, p * Hp
    Bp = B // p

    # ---- weights: pad hidden, fold b2 into a constant-1 unit, block-diag ----
    w1_pad = jnp.zeros((D, Hp), dtype).at[:, :H].set(w1.astype(dtype))
    b1_pad = (jnp.zeros((1, Hp), jnp.float32)
              .at[0, :H].set(b1.astype(jnp.float32))
              .at[0, H].set(1.0))                                  # always-on unit
    w2_pad = (jnp.zeros((Hp, 1), jnp.float32)
              .at[:H, 0].set(w2.astype(jnp.float32))
              .at[H, 0].set(b2.astype(jnp.float32)))               # carries b2
    if p > 1:
        eye_f32 = jnp.eye(p, dtype=jnp.float32)
        w1_blk = jnp.kron(eye_f32.astype(dtype), w1_pad)           # (p*D, p*Hp)
        w2_blk = jnp.kron(eye_f32, w2_pad)                          # (p*Hp, p)
        b1_blk = jnp.tile(b1_pad, (1, p))                           # (1, p*Hp)
    else:
        w1_blk, w2_blk, b1_blk = w1_pad, w2_pad, b1_pad

    # x packing is a pure row-major reshape (no HBM copy).
    xp = x.reshape(Bp, K)

    # ---- tile sizing from the real (lane-padded) VMEM footprint -------------
    x_row = _lane_pad(K) * itemsize            # x block bytes per packed row
    o_row = _lane_pad(p) * itemsize            # out block bytes per packed row
    h_row = _lane_pad(N1) * 4                  # f32 hidden tensor per packed row
    per_row = 2 * (x_row + o_row) + 2 * h_row  # double-buffered I/O + h (+ temp)
    resident = 2 * (_sub_pad(K) * _lane_pad(N1) * itemsize         # W1
                    + 8 * _lane_pad(N1) * 4                        # b1
                    + _sub_pad(N1) * _lane_pad(p) * 4)             # W2

    cap = _vmem_capacity_bytes()
    # Per-generation budget: ~half of v7x's 64 MiB; up to cap-32MiB on 128 MiB parts.
    budget = (cap - 32 * 1024 * 1024) if cap >= 128 * 1024 * 1024 else cap // 2
    avail = max(budget - resident, 2 * 1024 * 1024)

    tp = min(avail // per_row, _MAX_TILE, _round_up(Bp, 8))
    # Megacore: guarantee >=2 (prefer 4) grid steps for big batches, but keep
    # tiles >= _MIN_TILE packed rows so per-step overhead stays amortized.
    if Bp >= 2 * _MIN_TILE:
        want = -(-Bp // (4 if Bp >= 8 * _MIN_TILE else 2))
        tp = min(tp, _round_up(want, _MIN_TILE))
    tp = max(8, _round_up(int(tp), 8))
    grid = (pl.cdiv(Bp, tp),)

    vmem_limit = int(min(cap, max(per_row * tp + resident + 8 * 1024 * 1024,
                                  16 * 1024 * 1024)))

    rows = grid[0] * tp   # padded packed rows actually processed
    cost = pl.CostEstimate(
        flops=int(2 * rows * (K * N1 + N1 * p)),
        transcendentals=0,
        bytes_accessed=int(rows * (x_row + o_row)
                           + (w1_blk.size + b1_blk.size) * itemsize
                           + w2_blk.size * 4),
    )

    out = pl.pallas_call(
        _mlp_kernel,
        out_shape=jax.ShapeDtypeStruct((Bp, p), dtype),
        grid_spec=pltpu.PrefetchScalarGridSpec(
            num_scalar_prefetch=0,
            grid=grid,
            in_specs=[
                pl.BlockSpec((tp, K), lambda i: (i, 0)),   # x: streamed per tile
                pl.BlockSpec((K, N1), lambda i: (0, 0)),   # W1: VMEM-resident
                pl.BlockSpec((1, N1), lambda i: (0, 0)),   # b1: VMEM-resident
                pl.BlockSpec((N1, p), lambda i: (0, 0)),   # W2 (+b2): VMEM-resident
            ],
            out_specs=pl.BlockSpec((tp, p), lambda i: (i, 0)),
        ),
        compiler_params=pltpu.CompilerParams(
            dimension_semantics=("parallel",),
            vmem_limit_bytes=vmem_limit,
        ),
        cost_estimate=cost,
    )(xp, w1_blk, b1_blk, w2_blk)

    # (B/p, p) row-major == (B, 1).
    return out.reshape(B, 1)


def init_params(key, input_dim, hidden=50):
    """PyTorch nn.Linear-style init (uniform +/- 1/sqrt(fan_in))."""
    k1, k2, k3, k4 = jax.random.split(key, 4)
    bound1 = 1.0 / jnp.sqrt(input_dim)
    bound2 = 1.0 / jnp.sqrt(hidden)
    w1 = jax.random.uniform(k1, (input_dim, hidden), jnp.float32, -bound1, bound1)
    b1 = jax.random.uniform(k2, (hidden,), jnp.float32, -bound1, bound1)
    w2 = jax.random.uniform(k3, (hidden, 1), jnp.float32, -bound2, bound2)
    b2 = jax.random.uniform(k4, (1,), jnp.float32, -bound2, bound2)
    return w1, b1, w2, b2


def _ref_forward(x, w1, b1, w2, b2):
    h = jnp.maximum(x @ w1 + b1.reshape(1, -1), 0.0)
    return h @ w2.reshape(-1, 1) + b2.reshape(1, 1)


if __name__ == "__main__":
    key = jax.random.PRNGKey(0)
    hidden = 50

    # Exact-valued checks: all values in {-1,0,1}, so every product / partial sum
    # is exactly representable even under bf16 MXU passes -> kernel must match
    # the XLA reference to f32 ulp on all code paths (packing, tail blocks, ...).
    def int_vals(k, shape):
        return jax.random.randint(k, shape, -1, 2).astype(jnp.float32)

    configs = [
        (16, 8),     # packed path (p = 8), tiny batch
        (16, 301),   # odd batch -> p = 1, partial (non-multiple-of-8) tail block
        (40, 64),    # p = 2 path (p*D = 80 < 128)
        (200, 16),   # D > 128 -> p = 1, wide-K path
    ]
    for input_dim, batch in configs:
        key, kx, k1, k2, k3, k4 = jax.random.split(key, 6)
        x = int_vals(kx, (batch, input_dim))
        w1 = int_vals(k1, (input_dim, hidden))
        b1 = int_vals(k2, (hidden,))
        w2 = int_vals(k3, (hidden, 1))
        b2 = int_vals(k4, (1,))
        out = jax.block_until_ready(score_network_scalar(x, w1, b1, w2, b2))
        ref = _ref_forward(x, w1, b1, w2, b2)
        assert out.shape == (batch, 1), (out.shape, batch)
        assert jnp.allclose(out, ref, atol=1e-5, rtol=1e-5), (input_dim, batch)

    # Realistic weights / inputs (tolerance covers MXU bf16-pass rounding in
    # both the kernel and the XLA reference matmuls).
    key, kx, kp = jax.random.split(key, 3)
    input_dim, batch = 16, 300
    w1, b1, w2, b2 = init_params(kp, input_dim, hidden)
    x = jax.random.normal(kx, (batch, input_dim), dtype=jnp.float32)
    out = jax.block_until_ready(score_network_scalar(x, w1, b1, w2, b2))
    ref = _ref_forward(x, w1, b1, w2, b2)
    assert out.shape == (batch, 1)
    assert jnp.allclose(out, ref, atol=5e-3, rtol=5e-3)

    print("KERNEL_OK")
</pallas_src>

<mosaic_0001>
module attributes {stable_mosaic.version = 11 : i64} {
  func.func @_mlp_kernel(%arg0: i32, %arg1: memref<8x128xf32, #tpu.memory_space<vmem>>, %arg2: memref<128x1024xf32, #tpu.memory_space<vmem>>, %arg3: memref<1x1024xf32, #tpu.memory_space<vmem>>, %arg4: memref<1024x8xf32, #tpu.memory_space<vmem>>, %arg5: memref<8x8xf32, #tpu.memory_space<vmem>>) attributes {dimension_semantics = [#tpu.dimension_semantics<parallel>], iteration_bounds = array<i64: 1>, scalar_prefetch = 0 : i64, scratch_operands = 0 : i64, tpu.core_type = #tpu.core_type<tc>, window_params = [{transform_indices = @transform_0, window_bounds = array<i64: 8, 128>}, {pipeline_mode = #tpu.pipeline_mode<synchronous>, transform_indices = @transform_1, window_bounds = array<i64: 128, 1024>}, {pipeline_mode = #tpu.pipeline_mode<synchronous>, transform_indices = @transform_2, window_bounds = array<i64: 1, 1024>}, {pipeline_mode = #tpu.pipeline_mode<synchronous>, transform_indices = @transform_3, window_bounds = array<i64: 1024, 8>}, {transform_indices = @transform_4, window_bounds = array<i64: 8, 8>}]} {
    %c0 = arith.constant 0 : index
    %c0_0 = arith.constant 0 : index
    %0 = vector.load %arg1[%c0, %c0_0] : memref<8x128xf32, #tpu.memory_space<vmem>>, vector<8x128xf32>
    %c0_1 = arith.constant 0 : index
    %c0_2 = arith.constant 0 : index
    %1 = vector.load %arg2[%c0_1, %c0_2] : memref<128x1024xf32, #tpu.memory_space<vmem>>, vector<128x1024xf32>
    %cst = arith.constant dense<0.000000e+00> : vector<8x1024xf32>
    %2 = tpu.matmul %0, %1, %cst {dimension_numbers = #tpu.dot_dimension_numbers<[1], [0], [0], [1], [0, 0, 1, 1], [], []>} : vector<8x128xf32>, vector<128x1024xf32>, vector<8x1024xf32> -> vector<8x1024xf32>
    %c0_3 = arith.constant 0 : index
    %c0_4 = arith.constant 0 : index
    %3 = vector.load %arg3[%c0_3, %c0_4] : memref<1x1024xf32, #tpu.memory_space<vmem>>, vector<1x1024xf32>
    %4 = vector.broadcast %3 : vector<1x1024xf32> to vector<8x1024xf32>
    %5 = arith.addf %2, %4 : vector<8x1024xf32>
    %cst_5 = arith.constant 0.000000e+00 : f32
    %6 = vector.broadcast %cst_5 : f32 to vector<8x1024xf32>
    %7 = arith.maximumf %5, %6 : vector<8x1024xf32>
    %c0_6 = arith.constant 0 : index
    %c0_7 = arith.constant 0 : index
    %8 = vector.load %arg4[%c0_6, %c0_7] : memref<1024x8xf32, #tpu.memory_space<vmem>>, vector<1024x8xf32>
    %cst_8 = arith.constant dense<0.000000e+00> : vector<8x8xf32>
    %9 = tpu.matmul %7, %8, %cst_8 {dimension_numbers = #tpu.dot_dimension_numbers<[1], [0], [0], [1], [0, 0, 1, 1], [], []>} : vector<8x1024xf32>, vector<1024x8xf32>, vector<8x8xf32> -> vector<8x8xf32>
    %c0_9 = arith.constant 0 : index
    %c0_10 = arith.constant 0 : index
    %10 = vector.load %arg5[%c0_9, %c0_10] : memref<8x8xf32, #tpu.memory_space<vmem>>, vector<8x8xf32>
    tpu.vector_store %arg5[%c0_9, %c0_10], %9 {strides = array<i32>} : memref<8x8xf32, #tpu.memory_space<vmem>>, vector<8x8xf32>,
    return
  }
  func.func @transform_0(%arg0: i32) -> (i32, i32) {
    %c0_i32 = arith.constant 0 : i32
    %c0_i32_0 = arith.constant 0 : i32
    return %arg0, %c0_i32 : i32, i32
  }
  func.func @transform_1(%arg0: i32) -> (i32, i32) {
    %c0_i32 = arith.constant 0 : i32
    %c0_i32_0 = arith.constant 0 : i32
    %c0_i32_1 = arith.constant 0 : i32
    return %c0_i32, %c0_i32_0 : i32, i32
  }
  func.func @transform_2(%arg0: i32) -> (i32, i32) {
    %c0_i32 = arith.constant 0 : i32
    %c0_i32_0 = arith.constant 0 : i32
    %c0_i32_1 = arith.constant 0 : i32
    return %c0_i32, %c0_i32_0 : i32, i32
  }
  func.func @transform_3(%arg0: i32) -> (i32, i32) {
    %c0_i32 = arith.constant 0 : i32
    %c0_i32_0 = arith.constant 0 : i32
    %c0_i32_1 = arith.constant 0 : i32
    return %c0_i32, %c0_i32_0 : i32, i32
  }
  func.func @transform_4(%arg0: i32) -> (i32, i32) {
    %c0_i32 = arith.constant 0 : i32
    %c0_i32_0 = arith.constant 0 : i32
    return %arg0, %c0_i32 : i32, i32
  }
}

</mosaic_0001>

<bundles_post_ra>
// kernel: tpu_custom_call.1
= control target key start
LH: loop header
LB: loop body
LE: loop exit
PB: predicated region body
PF: predicated region fallthrough
CT: control target
= control target key end

     0   :  { %9 = vsyncpa [#allocation3], 0  ;;  %v1331_v6 = vmov 0.0   ;;  %vm889_vm0 = vcmask 64512   ;;  %s2176_s0 = inlined_call_operand.vmem [shape: f32[1,128], index: 0, kind: input, shape index: {}]   ;;  %s2177_s1 = inlined_call_operand.vmem [shape: f32[128,1024], index: 1, kind: input, shape index: {}]   ;;  %s2178_s2 = inlined_call_operand.vmem [shape: f32[1,1024], index: 2, kind: input, shape index: {}]   ;;  %s2179_s3 = inlined_call_operand.vmem [shape: f32[1024,8], index: 3, kind: input, shape index: {}]   ;;  %s2180_s4 = inlined_call_operand.hbm [shape: f32[1,8], index: 4, kind: output, shape index: {}]  }
   0x1   :  { %v20_v0 = vld [vmem:[%s2177_s1 + $0x8] sm:$0xff]  ;;  %v22_v3 = vld [vmem:[%s2177_s1 + $0x18] sm:$0xff]  ;;  %v19_v5 = vld [vmem:[%s2177_s1] sm:$0xff]  ;;  %253 = vmatprep.mubr.f32.mxu0 %v1331_v6  ;;  %324 = vmatprep.mubr.f32.mxu1 %v1331_v6 }
   0x2   :  { %v28_v1 = vld [vmem:[%s2177_s1 + $0x48] sm:$0xff]  ;;  %v30_v4 = vld [vmem:[%s2177_s1 + $0x58] sm:$0xff]  ;;  %v27_v8 = vld [vmem:[%s2177_s1 + $0x40] sm:$0xff] }
   0x3   :  { %v1047_v2 = vpack.c.bf16 %v28_v1, %v20_v0  ;;  %v1079_v7 = vpack.c.bf16 %v30_v4, %v22_v3  ;;  %v21_v9 = vld [vmem:[%s2177_s1 + $0x10] sm:$0xff]  ;;  %v1049_v11 = vpack.c.bf16 %v27_v8, %v19_v5  ;;  %v36_v13 = vld [vmem:[%s2177_s1 + $0x88] sm:$0xff]  ;;  %v38_v15 = vld [vmem:[%s2177_s1 + $0x98] sm:$0xff] }
   0x4   :  { %v29_v10 = vld [vmem:[%s2177_s1 + $0x50] sm:$0xff]  ;;  %v44_v14 = vld [vmem:[%s2177_s1 + $0xc8] sm:$0xff]  ;;  %v46_v17 = vld [vmem:[%s2177_s1 + $0xd8] sm:$0xff] }
   0x5   :  { %1048 = vmatprep.subr.bf16.mxu0 %v1047_v2  ;;  %v1081_v12 = vpack.c.bf16 %v29_v10, %v21_v9  ;;  %1080 = vmatprep.subr.bf16.mxu1 %v1079_v7  ;;  %v1051_v16 = vpack.c.bf16 %v44_v14, %v36_v13  ;;  %v35_v18 = vld [vmem:[%s2177_s1 + $0x80] sm:$0xff]  ;;  %v1083_v20 = vpack.c.bf16 %v46_v17, %v38_v15  ;;  %v37_v22 = vld [vmem:[%s2177_s1 + $0x90] sm:$0xff]  ;;  %v52_v24 = vld [vmem:[%s2177_s1 + $0x108] sm:$0xff] }
   0x6   :  { %v43_v19 = vld [vmem:[%s2177_s1 + $0xc0] sm:$0xff]  ;;  %1050 = vmatpush1.bf16.msra.mxu0 %v1049_v11  ;;  %v45_v23 = vld [vmem:[%s2177_s1 + $0xd0] sm:$0xff]  ;;  %v60_v26 = vld [vmem:[%s2177_s1 + $0x148] sm:$0xff] }
   0x7   :  { %1082 = vmatpush1.bf16.msra.mxu1 %v1081_v12  ;;  %v1053_v21 = vpack.c.bf16 %v43_v19, %v35_v18  ;;  %1052 = vmatprep.subr.bf16.mxu0 %v1051_v16  ;;  %v1085_v25 = vpack.c.bf16 %v45_v23, %v37_v22  ;;  %v54_v27 = vld [vmem:[%s2177_s1 + $0x118] sm:$0xff]  ;;  %v1055_v29 = vpack.c.bf16 %v60_v26, %v52_v24  ;;  %v51_v31 = vld [vmem:[%s2177_s1 + $0x100] sm:$0xff]  ;;  %v53_v33 = vld [vmem:[%s2177_s1 + $0x110] sm:$0xff] }
   0x8   :  { %v62_v28 = vld [vmem:[%s2177_s1 + $0x158] sm:$0xff]  ;;  %1084 = vmatprep.subr.bf16.mxu1 %v1083_v20  ;;  %v59_v32 = vld [vmem:[%s2177_s1 + $0x140] sm:$0xff]  ;;  %v61_v34 = vld [vmem:[%s2177_s1 + $0x150] sm:$0xff] }
   0x9   :  { %v1087_v30 = vpack.c.bf16 %v62_v28, %v54_v27  ;;  %v68_v35 = vld [vmem:[%s2177_s1 + $0x188] sm:$0xff]  ;;  %v1057_v37 = vpack.c.bf16 %v59_v32, %v51_v31  ;;  %v1089_v38 = vpack.c.bf16 %v61_v34, %v53_v33  ;;  %v70_v39 = vld [vmem:[%s2177_s1 + $0x198] sm:$0xff]  ;;  %v67_v41 = vld [vmem:[%s2177_s1 + $0x180] sm:$0xff] }
   0xa   :  { %v76_v36 = vld [vmem:[%s2177_s1 + $0x1c8] sm:$0xff]  ;;  %1054 = vmatpush1.bf16.msra.mxu0 %v1053_v21  ;;  %v78_v40 = vld [vmem:[%s2177_s1 + $0x1d8] sm:$0xff]  ;;  %v75_v44 = vld [vmem:[%s2177_s1 + $0x1c0] sm:$0xff] }
   0xb   :  { %1086 = vmatpush1.bf16.msra.mxu1 %v1085_v25  ;;  %1056 = vmatprep.subr.bf16.mxu0 %v1055_v29  ;;  %v1059_v42 = vpack.c.bf16 %v76_v36, %v68_v35  ;;  %v1091_v43 = vpack.c.bf16 %v78_v40, %v70_v39  ;;  %v69_v45 = vld [vmem:[%s2177_s1 + $0x190] sm:$0xff]  ;;  %v84_v47 = vld [vmem:[%s2177_s1 + $0x208] sm:$0xff]  ;;  %v86_v49 = vld [vmem:[%s2177_s1 + $0x218] sm:$0xff]  ;;  %v1061_v51 = vpack.c.bf16 %v75_v44, %v67_v41 }
   0xc   :  { %1088 = vmatprep.subr.bf16.mxu1 %v1087_v30  ;;  %v77_v46 = vld [vmem:[%s2177_s1 + $0x1d0] sm:$0xff]  ;;  %v92_v48 = vld [vmem:[%s2177_s1 + $0x248] sm:$0xff]  ;;  %v94_v50 = vld [vmem:[%s2177_s1 + $0x258] sm:$0xff] }
   0xd   :  { %v1093_v52 = vpack.c.bf16 %v77_v46, %v69_v45  ;;  %v83_v53 = vld [vmem:[%s2177_s1 + $0x200] sm:$0xff]  ;;  %v1063_v55 = vpack.c.bf16 %v92_v48, %v84_v47  ;;  %v1095_v56 = vpack.c.bf16 %v94_v50, %v86_v49  ;;  %v85_v57 = vld [vmem:[%s2177_s1 + $0x210] sm:$0xff]  ;;  %v100_v59 = vld [vmem:[%s2177_s1 + $0x288] sm:$0xff] }
   0xe   :  { %1058 = vmatpush1.bf16.msra.mxu0 %v1057_v37  ;;  %v91_v54 = vld [vmem:[%s2177_s1 + $0x240] sm:$0xff]  ;;  %v93_v58 = vld [vmem:[%s2177_s1 + $0x250] sm:$0xff]  ;;  %v108_v60 = vld [vmem:[%s2177_s1 + $0x2c8] sm:$0xff] }
   0xf   :  { %1090 = vmatpush1.bf16.msra.mxu1 %v1089_v38  ;;  %1060 = vmatprep.subr.bf16.mxu0 %v1059_v42  ;;  %v102_v61 = vld [vmem:[%s2177_s1 + $0x298] sm:$0xff]  ;;  %v1065_v63 = vpack.c.bf16 %v91_v54, %v83_v53  ;;  %v1097_v0 = vpack.c.bf16 %v93_v58, %v85_v57  ;;  %v99_v1 = vld [vmem:[%s2177_s1 + $0x280] sm:$0xff]  ;;  %v1067_v3 = vpack.c.bf16 %v108_v60, %v100_v59  ;;  %v101_v5 = vld [vmem:[%s2177_s1 + $0x290] sm:$0xff] }
  0x10   :  { %1092 = vmatprep.subr.bf16.mxu1 %v1091_v43  ;;  %v110_v62 = vld [vmem:[%s2177_s1 + $0x2d8] sm:$0xff]  ;;  %v107_v2 = vld [vmem:[%s2177_s1 + $0x2c0] sm:$0xff]  ;;  %v109_v7 = vld [vmem:[%s2177_s1 + $0x2d0] sm:$0xff] }
  0x11   :  { %v1099_v4 = vpack.c.bf16 %v110_v62, %v102_v61  ;;  %v116_v8 = vld [vmem:[%s2177_s1 + $0x308] sm:$0xff]  ;;  %v118_v10 = vld [vmem:[%s2177_s1 + $0x318] sm:$0xff]  ;;  %v1069_v12 = vpack.c.bf16 %v107_v2, %v99_v1  ;;  %v1101_v13 = vpack.c.bf16 %v109_v7, %v101_v5  ;;  %v115_v14 = vld [vmem:[%s2177_s1 + $0x300] sm:$0xff] }
  0x12   :  { %1062 = vmatpush1.bf16.msra.mxu0 %v1061_v51  ;;  %v124_v9 = vld [vmem:[%s2177_s1 + $0x348] sm:$0xff]  ;;  %v126_v11 = vld [vmem:[%s2177_s1 + $0x358] sm:$0xff]  ;;  %v123_v15 = vld [vmem:[%s2177_s1 + $0x340] sm:$0xff] }
  0x13   :  { %1094 = vmatpush1.bf16.msra.mxu1 %v1093_v52  ;;  %1064 = vmatprep.subr.bf16.mxu0 %v1063_v55  ;;  %v1071_v16 = vpack.c.bf16 %v124_v9, %v116_v8  ;;  %v1103_v17 = vpack.c.bf16 %v126_v11, %v118_v10  ;;  %v117_v18 = vld [vmem:[%s2177_s1 + $0x310] sm:$0xff]  ;;  %v132_v20 = vld [vmem:[%s2177_s1 + $0x388] sm:$0xff]  ;;  %v134_v22 = vld [vmem:[%s2177_s1 + $0x398] sm:$0xff]  ;;  %v1073_v24 = vpack.c.bf16 %v123_v15, %v115_v14 }
  0x14   :  { %1096 = vmatprep.subr.bf16.mxu1 %v1095_v56  ;;  %v125_v19 = vld [vmem:[%s2177_s1 + $0x350] sm:$0xff]  ;;  %v140_v21 = vld [vmem:[%s2177_s1 + $0x3c8] sm:$0xff]  ;;  %v142_v23 = vld [vmem:[%s2177_s1 + $0x3d8] sm:$0xff] }
  0x15   :  { %v1105_v25 = vpack.c.bf16 %v125_v19, %v117_v18  ;;  %v131_v26 = vld [vmem:[%s2177_s1 + $0x380] sm:$0xff]  ;;  %v1075_v28 = vpack.c.bf16 %v140_v21, %v132_v20  ;;  %v1107_v29 = vpack.c.bf16 %v142_v23, %v134_v22  ;;  %v133_v30 = vld [vmem:[%s2177_s1 + $0x390] sm:$0xff]  ;;  %v24_v32 = vld [vmem:[%s2177_s1 + $0x28] sm:$0xff] }
  0x16   :  { %1066 = vmatpush1.bf16.msra.mxu0 %v1065_v63  ;;  %v139_v27 = vld [vmem:[%s2177_s1 + $0x3c0] sm:$0xff]  ;;  %v141_v31 = vld [vmem:[%s2177_s1 + $0x3d0] sm:$0xff]  ;;  %v32_v33 = vld [vmem:[%s2177_s1 + $0x68] sm:$0xff] }
  0x17   :  { %1098 = vmatpush1.bf16.msra.mxu1 %v1097_v0  ;;  %1068 = vmatprep.subr.bf16.mxu0 %v1067_v3  ;;  %v26_v34 = vld [vmem:[%s2177_s1 + $0x38] sm:$0xff]  ;;  %v1077_v36 = vpack.c.bf16 %v139_v27, %v131_v26  ;;  %v1109_v37 = vpack.c.bf16 %v141_v31, %v133_v30  ;;  %v23_v38 = vld [vmem:[%s2177_s1 + $0x20] sm:$0xff]  ;;  %v1111_v40 = vpack.c.bf16 %v32_v33, %v24_v32  ;;  %v25_v42 = vld [vmem:[%s2177_s1 + $0x30] sm:$0xff] }
  0x18   :  { %1100 = vmatprep.subr.bf16.mxu1 %v1099_v4  ;;  %v34_v35 = vld [vmem:[%s2177_s1 + $0x78] sm:$0xff]  ;;  %v31_v39 = vld [vmem:[%s2177_s1 + $0x60] sm:$0xff]  ;;  %v33_v43 = vld [vmem:[%s2177_s1 + $0x70] sm:$0xff] }
  0x19   :  { %v1143_v41 = vpack.c.bf16 %v34_v35, %v26_v34  ;;  %v40_v44 = vld [vmem:[%s2177_s1 + $0xa8] sm:$0xff]  ;;  %v42_v46 = vld [vmem:[%s2177_s1 + $0xb8] sm:$0xff]  ;;  %v1593_v48 = vld [vmem:[%s2176_s0] sm:$0xff]  ;;  %v1113_v49 = vpack.c.bf16 %v31_v39, %v23_v38  ;;  %v1145_v50 = vpack.c.bf16 %v33_v43, %v25_v42 }
  0x1a   :  { %1070 = vmatpush1.bf16.msra.mxu0 %v1069_v12  ;;  %v48_v45 = vld [vmem:[%s2177_s1 + $0xe8] sm:$0xff]  ;;  %v50_v47 = vld [vmem:[%s2177_s1 + $0xf8] sm:$0xff]  ;;  %v39_v51 = vld [vmem:[%s2177_s1 + $0xa0] sm:$0xff] }
  0x1b   :  { %1102 = vmatpush1.bf16.msra.mxu1 %v1101_v13  ;;  %1072 = vmatprep.subr.bf16.mxu0 %v1071_v16  ;;  %v47_v52 = vld [vmem:[%s2177_s1 + $0xe0] sm:$0xff]  ;;  %v1115_v53 = vpack.c.bf16 %v48_v45, %v40_v44  ;;  %v1147_v54 = vpack.c.bf16 %v50_v47, %v42_v46  ;;  %v41_v55 = vld [vmem:[%s2177_s1 + $0xb0] sm:$0xff]  ;;  %v56_v57 = vld [vmem:[%s2177_s1 + $0x128] sm:$0xff] }
  0x1c   :  { %1104 = vmatprep.subr.bf16.mxu1 %v1103_v17  ;;  %v49_v56 = vld [vmem:[%s2177_s1 + $0xf0] sm:$0xff]  ;;  %v64_v58 = vld [vmem:[%s2177_s1 + $0x168] sm:$0xff]  ;;  %v58_v59 = vld [vmem:[%s2177_s1 + $0x138] sm:$0xff]  ;;  %v1117_v61 = vpack.c.bf16 %v47_v52, %v39_v51 }
  0x1d   :  { %v66_v60 = vld [vmem:[%s2177_s1 + $0x178] sm:$0xff]  ;;  %v1149_v62 = vpack.c.bf16 %v49_v56, %v41_v55  ;;  %v55_v63 = vld [vmem:[%s2177_s1 + $0x120] sm:$0xff]  ;;  %v1119_v1 = vpack.c.bf16 %v64_v58, %v56_v57  ;;  %v57_v3 = vld [vmem:[%s2177_s1 + $0x130] sm:$0xff] }
  0x1e   :  { %1074 = vmatpush1.bf16.msra.mxu0 %v1073_v24  ;;  %v63_v0 = vld [vmem:[%s2177_s1 + $0x160] sm:$0xff]  ;;  %v1151_v2 = vpack.c.bf16 %v66_v60, %v58_v59  ;;  %v65_v4 = vld [vmem:[%s2177_s1 + $0x170] sm:$0xff]  ;;  %v72_v5 = vld [vmem:[%s2177_s1 + $0x1a8] sm:$0xff] }
  0x1f   :  { %1106 = vmatpush1.bf16.msra.mxu1 %v1105_v25  ;;  %1076 = vmatprep.subr.bf16.mxu0 %v1075_v28  ;;  %v80_v7 = vld [vmem:[%s2177_s1 + $0x1e8] sm:$0xff]  ;;  %v74_v8 = vld [vmem:[%s2177_s1 + $0x1b8] sm:$0xff]  ;;  %v1121_v10 = vpack.c.bf16 %v63_v0, %v55_v63  ;;  %v1153_v11 = vpack.c.bf16 %v65_v4, %v57_v3  ;;  %v71_v12 = vld [vmem:[%s2177_s1 + $0x1a0] sm:$0xff] }
  0x20   :  { %1108 = vmatprep.subr.bf16.mxu1 %v1107_v29  ;;  %v82_v9 = vld [vmem:[%s2177_s1 + $0x1f8] sm:$0xff]  ;;  %v79_v13 = vld [vmem:[%s2177_s1 + $0x1e0] sm:$0xff]  ;;  %v1123_v14 = vpack.c.bf16 %v80_v7, %v72_v5  ;;  %v81_v16 = vld [vmem:[%s2177_s1 + $0x1f0] sm:$0xff] }
  0x21   :  { %v1155_v15 = vpack.c.bf16 %v82_v9, %v74_v8  ;;  %v88_v17 = vld [vmem:[%s2177_s1 + $0x228] sm:$0xff]  ;;  %v90_v19 = vld [vmem:[%s2177_s1 + $0x238] sm:$0xff]  ;;  %v1125_v21 = vpack.c.bf16 %v79_v13, %v71_v12  ;;  %v87_v23 = vld [vmem:[%s2177_s1 + $0x220] sm:$0xff] }
  0x22   :  { %1078 = vmatpush1.bf16.msra.mxu0 %v1077_v36  ;;  %v96_v18 = vld [vmem:[%s2177_s1 + $0x268] sm:$0xff]  ;;  %v98_v20 = vld [vmem:[%s2177_s1 + $0x278] sm:$0xff]  ;;  %v95_v24 = vld [vmem:[%s2177_s1 + $0x260] sm:$0xff] }
  0x23   :  { %1110 = vmatpush1.bf16.msra.mxu1 %v1109_v37  ;;  %1112 = vmatprep.subr.bf16.mxu0 %v1111_v40  ;;  %v1127_v25 = vpack.c.bf16 %v96_v18, %v88_v17  ;;  %v1159_v26 = vpack.c.bf16 %v98_v20, %v90_v19  ;;  %v89_v27 = vld [vmem:[%s2177_s1 + $0x230] sm:$0xff]  ;;  %v104_v29 = vld [vmem:[%s2177_s1 + $0x2a8] sm:$0xff]  ;;  %v106_v31 = vld [vmem:[%s2177_s1 + $0x2b8] sm:$0xff]  ;;  %v1129_v33 = vpack.c.bf16 %v95_v24, %v87_v23 }
  0x24   :  { %1144 = vmatprep.subr.bf16.mxu1 %v1143_v41  ;;  %v97_v28 = vld [vmem:[%s2177_s1 + $0x270] sm:$0xff]  ;;  %v112_v30 = vld [vmem:[%s2177_s1 + $0x2e8] sm:$0xff]  ;;  %v114_v32 = vld [vmem:[%s2177_s1 + $0x2f8] sm:$0xff] }
  0x25   :  { %254 = vmatmul.mubr.f32.vlgmr.msra.gmra.mrb[0].mxu0 %v1593_v48  ;;  %v1161_v34 = vpack.c.bf16 %v97_v28, %v89_v27  ;;  %v103_v35 = vld [vmem:[%s2177_s1 + $0x2a0] sm:$0xff]  ;;  %v1131_v37 = vpack.c.bf16 %v112_v30, %v104_v29  ;;  %v1163_v38 = vpack.c.bf16 %v114_v32, %v106_v31  ;;  %v105_v39 = vld [vmem:[%s2177_s1 + $0x2b0] sm:$0xff]  ;;  %v120_v41 = vld [vmem:[%s2177_s1 + $0x328] sm:$0xff] }
  0x26   :  { %325 = vmatmul.mubr.f32.vlgmr.msra.gmra.mrb[0].mxu1 %v1593_v48  ;;  %1114 = vmatpush1.bf16.msra.mxu0 %v1113_v49  ;;  %v111_v36 = vld [vmem:[%s2177_s1 + $0x2e0] sm:$0xff]  ;;  %v113_v40 = vld [vmem:[%s2177_s1 + $0x2f0] sm:$0xff]  ;;  %v128_v42 = vld [vmem:[%s2177_s1 + $0x368] sm:$0xff] }
  0x27   :  { %1146 = vmatpush1.bf16.msra.mxu1 %v1145_v50  ;;  %1116 = vmatprep.subr.bf16.mxu0 %v1115_v53  ;;  %v122_v43 = vld [vmem:[%s2177_s1 + $0x338] sm:$0xff]  ;;  %v1133_v45 = vpack.c.bf16 %v111_v36, %v103_v35  ;;  %v1165_v46 = vpack.c.bf16 %v113_v40, %v105_v39  ;;  %v119_v47 = vld [vmem:[%s2177_s1 + $0x320] sm:$0xff]  ;;  %v1135_v50 = vpack.c.bf16 %v128_v42, %v120_v41  ;;  %v121_v52 = vld [vmem:[%s2177_s1 + $0x330] sm:$0xff] }
  0x28   :  { %1148 = vmatprep.subr.bf16.mxu1 %v1147_v54  ;;  %395 = vmatprep.mubr.f32.mxu0 %v1331_v6  ;;  %v130_v44 = vld [vmem:[%s2177_s1 + $0x378] sm:$0xff]  ;;  %v127_v49 = vld [vmem:[%s2177_s1 + $0x360] sm:$0xff]  ;;  %v129_v53 = vld [vmem:[%s2177_s1 + $0x370] sm:$0xff] }
  0x29   :  { %466 = vmatprep.mubr.f32.mxu1 %v1331_v6  ;;  %v73_v6 = vld [vmem:[%s2177_s1 + $0x1b0] sm:$0xff]  ;;  %v1167_v51 = vpack.c.bf16 %v130_v44, %v122_v43  ;;  %v136_v54 = vld [vmem:[%s2177_s1 + $0x3a8] sm:$0xff]  ;;  %v138_v56 = vld [vmem:[%s2177_s1 + $0x3b8] sm:$0xff]  ;;  %v1137_v58 = vpack.c.bf16 %v127_v49, %v119_v47  ;;  %v1169_v59 = vpack.c.bf16 %v129_v53, %v121_v52 }
  0x2a   :  { %1118 = vmatpush1.bf16.msra.mxu0 %v1117_v61  ;;  %v1157_v22 = vpack.c.bf16 %v81_v16, %v73_v6  ;;  %v144_v55 = vld [vmem:[%s2177_s1 + $0x3e8] sm:$0xff]  ;;  %v146_v57 = vld [vmem:[%s2177_s1 + $0x3f8] sm:$0xff]  ;;  %v135_v60 = vld [vmem:[%s2177_s1 + $0x3a0] sm:$0xff] }
  0x2b   :  { %1150 = vmatpush1.bf16.msra.mxu1 %v1149_v62  ;;  %1120 = vmatprep.subr.bf16.mxu0 %v1119_v1  ;;  %v143_v61 = vld [vmem:[%s2177_s1 + $0x3e0] sm:$0xff]  ;;  %v1139_v62 = vpack.c.bf16 %v144_v55, %v136_v54  ;;  %v1171_v63 = vpack.c.bf16 %v146_v57, %v138_v56  ;;  %v137_v0 = vld [vmem:[%s2177_s1 + $0x3b0] sm:$0xff]  ;;  %v498_v3 = vld [vmem:[%s2179_s3 + $0x88] sm:$0xff] }
  0x2c   :  { %1152 = vmatprep.subr.bf16.mxu1 %v1151_v2  ;;  %v145_v1 = vld [vmem:[%s2177_s1 + $0x3f0] sm:$0xff]  ;;  %v497_v2 = vld [vmem:[%s2179_s3 + $0x80] sm:$0xff]  ;;  %v530_v5 = vld [vmem:[%s2179_s3 + $0x188] sm:$0xff]  ;;  %v1141_v7 = vpack.c.bf16 %v143_v61, %v135_v60 }
  0x2d   :  { %v529_v4 = vld [vmem:[%s2179_s3 + $0x180] sm:$0xff]  ;;  %v1173_v8 = vpack.c.bf16 %v145_v1, %v137_v0  ;;  %v500_v6 = vld [vmem:[%s2179_s3 + $0x98] sm:$0xff]  ;;  %v531_v16 = vld [vmem:[%s2179_s3 + $0x190] sm:$0xff] }
  0x2e   :  { %1122 = vmatpush1.bf16.msra.mxu0 %v1121_v10  ;;  %v481_v9 = vld [vmem:[%s2179_s3] sm:$0xff]  ;;  %v482_v10 = vld [vmem:[%s2179_s3 + $0x8] sm:$0xff]  ;;  %v1207_v12 = vpack.c.bf16 %v530_v5, %v529_v4  ;;  %v532_v17 = vld [vmem:[%s2179_s3 + $0x198] sm:$0xff] }
  0x2f   :  { %1154 = vmatpush1.bf16.msra.mxu1 %v1153_v11  ;;  %1124 = vmatprep.subr.bf16.mxu0 %v1123_v14  ;;  %v1175_v11 = vpack.c.bf16 %v498_v3, %v497_v2  ;;  %v513_v13 = vld [vmem:[%s2179_s3 + $0x100] sm:$0xff]  ;;  %v514_v14 = vld [vmem:[%s2179_s3 + $0x108] sm:$0xff]  ;;  %v1177_v18 = vpack.c.bf16 %v482_v10, %v481_v9  ;;  %v483_v20 = vld [vmem:[%s2179_s3 + $0x10] sm:$0xff]  ;;  %v1211_v23 = vpack.c.bf16 %v532_v17, %v531_v16 }
  0x30   :  { %1156 = vmatprep.subr.bf16.mxu1 %v1155_v15  ;;  %v499_v15 = vld [vmem:[%s2179_s3 + $0x90] sm:$0xff]  ;;  %v1209_v19 = vpack.c.bf16 %v514_v14, %v513_v13  ;;  %v502_v27 = vld [vmem:[%s2179_s3 + $0xa8] sm:$0xff]  ;;  %v533_v28 = vld [vmem:[%s2179_s3 + $0x1a0] sm:$0xff] }
  0x31   :  { %v515_v24 = vld [vmem:[%s2179_s3 + $0x110] sm:$0xff]  ;;  %v534_v29 = vld [vmem:[%s2179_s3 + $0x1a8] sm:$0xff]  ;;  %v485_v32 = vld [vmem:[%s2179_s3 + $0x20] sm:$0xff] }
  0x32   :  { %1126 = vmatpush1.bf16.msra.mxu0 %v1125_v21  ;;  %v484_v21 = vld [vmem:[%s2179_s3 + $0x18] sm:$0xff]  ;;  %v1215_v35 = vpack.c.bf16 %v534_v29, %v533_v28  ;;  %v518_v36 = vld [vmem:[%s2179_s3 + $0x128] sm:$0xff]  ;;  %v535_v39 = vld [vmem:[%s2179_s3 + $0x1b0] sm:$0xff] }
  0x33   :  { %1158 = vmatpush1.bf16.msra.mxu1 %v1157_v22  ;;  %1128 = vmatprep.subr.bf16.mxu0 %v1127_v25  ;;  %v1179_v22 = vpack.c.bf16 %v500_v6, %v499_v15  ;;  %v516_v25 = vld [vmem:[%s2179_s3 + $0x118] sm:$0xff]  ;;  %v1181_v30 = vpack.c.bf16 %v484_v21, %v483_v20  ;;  %v487_v43 = vld [vmem:[%s2179_s3 + $0x30] sm:$0xff]  ;;  %v537_v52 = vld [vmem:[%s2179_s3 + $0x1c0] sm:$0xff] }
  0x34   :  { %1160 = vmatprep.subr.bf16.mxu1 %v1159_v26  ;;  %v501_v26 = vld [vmem:[%s2179_s3 + $0xa0] sm:$0xff]  ;;  %v1213_v31 = vpack.c.bf16 %v516_v25, %v515_v24  ;;  %v536_v40 = vld [vmem:[%s2179_s3 + $0x1b8] sm:$0xff]  ;;  %v519_v47 = vld [vmem:[%s2179_s3 + $0x130] sm:$0xff] }
  0x35   :  { %v488_v44 = vld [vmem:[%s2179_s3 + $0x38] sm:$0xff]  ;;  %v538_v53 = vld [vmem:[%s2179_s3 + $0x1c8] sm:$0xff]  ;;  %v489_v56 = vld [vmem:[%s2179_s3 + $0x40] sm:$0xff] }
  0x36   :  { %1130 = vmatpush1.bf16.msra.mxu0 %v1129_v33  ;;  %v486_v33 = vld [vmem:[%s2179_s3 + $0x28] sm:$0xff]  ;;  %v520_v49 = vld [vmem:[%s2179_s3 + $0x138] sm:$0xff]  ;;  %v1189_v54 = vpack.c.bf16 %v488_v44, %v487_v43  ;;  %v521_v60 = vld [vmem:[%s2179_s3 + $0x140] sm:$0xff] }
  0x37   :  { %1162 = vmatpush1.bf16.msra.mxu1 %v1161_v34  ;;  %1132 = vmatprep.subr.bf16.mxu0 %v1131_v37  ;;  %v1183_v34 = vpack.c.bf16 %v502_v27, %v501_v26  ;;  %v503_v37 = vld [vmem:[%s2179_s3 + $0xb0] sm:$0xff]  ;;  %v1185_v41 = vpack.c.bf16 %v486_v33, %v485_v32  ;;  %v1221_v55 = vpack.c.bf16 %v520_v49, %v519_v47  ;;  %v490_v57 = vld [vmem:[%s2179_s3 + $0x48] sm:$0xff]  ;;  %v540_v1 = vld [vmem:[%s2179_s3 + $0x1d8] sm:$0xff] }
  0x38   :  { %1164 = vmatprep.subr.bf16.mxu1 %v1163_v38  ;;  %v504_v38 = vld [vmem:[%s2179_s3 + $0xb8] sm:$0xff]  ;;  %v522_v61 = vld [vmem:[%s2179_s3 + $0x148] sm:$0xff]  ;;  %v539_v0 = vld [vmem:[%s2179_s3 + $0x1d0] sm:$0xff]  ;;  %v1193_v2 = vpack.c.bf16 %v490_v57, %v489_v56 }
  0x39   :  { %v1225_v3 = vpack.c.bf16 %v522_v61, %v521_v60  ;;  %v491_v4 = vld [vmem:[%s2179_s3 + $0x50] sm:$0xff]  ;;  %v492_v5 = vld [vmem:[%s2179_s3 + $0x58] sm:$0xff]  ;;  %v541_v13 = vld [vmem:[%s2179_s3 + $0x1e0] sm:$0xff] }
  0x3a   :  { %1134 = vmatpush1.bf16.msra.mxu0 %v1133_v45  ;;  %v1187_v45 = vpack.c.bf16 %v504_v38, %v503_v37  ;;  %v523_v9 = vld [vmem:[%s2179_s3 + $0x150] sm:$0xff]  ;;  %v524_v10 = vld [vmem:[%s2179_s3 + $0x158] sm:$0xff]  ;;  %v542_v14 = vld [vmem:[%s2179_s3 + $0x1e8] sm:$0xff]  ;;  %v1197_v15 = vpack.c.bf16 %v492_v5, %v491_v4 }
  0x3b   :  { %1166 = vmatpush1.bf16.msra.mxu1 %v1165_v46  ;;  %1136 = vmatprep.subr.bf16.mxu0 %v1135_v50  ;;  %v1219_v46 = vpack.c.bf16 %v536_v40, %v535_v39  ;;  %v505_v50 = vld [vmem:[%s2179_s3 + $0xc0] sm:$0xff]  ;;  %v1229_v6 = vpack.c.bf16 %v524_v10, %v523_v9  ;;  %v1231_v17 = vpack.c.bf16 %v542_v14, %v541_v13  ;;  %v511_v24 = vld [vmem:[%s2179_s3 + $0xf0] sm:$0xff]  ;;  %v512_v25 = vld [vmem:[%s2179_s3 + $0xf8] sm:$0xff] }
  0x3c   :  { %1168 = vmatprep.subr.bf16.mxu1 %v1167_v51  ;;  %v506_v51 = vld [vmem:[%s2179_s3 + $0xc8] sm:$0xff]  ;;  %v525_v20 = vld [vmem:[%s2179_s3 + $0x160] sm:$0xff]  ;;  %v543_v26 = vld [vmem:[%s2179_s3 + $0x1f0] sm:$0xff]  ;;  %v1203_v27 = vpack.c.bf16 %v512_v25, %v511_v24 }
  0x3d   :  { %v544_v28 = vld [vmem:[%s2179_s3 + $0x1f8] sm:$0xff]  ;;  %v495_v29 = vld [vmem:[%s2179_s3 + $0x70] sm:$0xff]  ;;  %v593_v37 = vld [vmem:[%s2179_s3 + $0x380] sm:$0xff] }
  0x3e   :  { %1138 = vmatpush1.bf16.msra.mxu0 %v1137_v58  ;;  %v1191_v58 = vpack.c.bf16 %v506_v51, %v505_v50  ;;  %v527_v33 = vld [vmem:[%s2179_s3 + $0x170] sm:$0xff]  ;;  %v594_v39 = vld [vmem:[%s2179_s3 + $0x388] sm:$0xff]  ;;  %v577_v61 = vld [vmem:[%s2179_s3 + $0x300] sm:$0xff] }
  0x3f   :  { %1170 = vmatpush1.bf16.msra.mxu1 %v1169_v59  ;;  %1140 = vmatprep.subr.bf16.mxu0 %v1139_v62  ;;  %v1223_v59 = vpack.c.bf16 %v538_v53, %v537_v52  ;;  %v507_v62 = vld [vmem:[%s2179_s3 + $0xd0] sm:$0xff]  ;;  %v1271_v40 = vpack.c.bf16 %v594_v39, %v593_v37  ;;  %v546_v56 = vld [vmem:[%s2179_s3 + $0x208] sm:$0xff]  ;;  %v596_v4 = vld [vmem:[%s2179_s3 + $0x398] sm:$0xff] }
  0x40   :  { %1172 = vmatprep.subr.bf16.mxu1 %v1171_v63  ;;  %v508_v63 = vld [vmem:[%s2179_s3 + $0xd8] sm:$0xff]  ;;  %v550_v24 = vld [vmem:[%s2179_s3 + $0x228] sm:$0xff] }
  0x41   :  { %v548_v13 = vld [vmem:[%s2179_s3 + $0x218] sm:$0xff] }
  0x42   :  { %1142 = vmatpush1.bf16.msra.mxu0 %v1141_v7  ;;  %v1195_v7 = vpack.c.bf16 %v508_v63, %v507_v62  ;;  %v578_v62 = vld [vmem:[%s2179_s3 + $0x308] sm:$0xff]  ;;  %v563_v63 = vld [vmem:[%s2179_s3 + $0x290] sm:$0xff]  ;;  %v584_v39 = vld [vmem:[%s2179_s3 + $0x338] sm:$0xff] }
  0x43   :  { %1174 = vmatpush1.bf16.msra.mxu1 %v1173_v8  ;;  %1176 = vmatprep.subr.bf16.mxu0 %v1175_v11  ;;  %v1227_v8 = vpack.c.bf16 %v540_v1, %v539_v0  ;;  %v509_v11 = vld [vmem:[%s2179_s3 + $0xe0] sm:$0xff] }
  0x44   :  { %1208 = vmatprep.subr.bf16.mxu1 %v1207_v12  ;;  %v510_v12 = vld [vmem:[%s2179_s3 + $0xe8] sm:$0xff] }
  0x45   :  { %396 = vmatmul.mubr.f32.vlgmr.msra.gmra.mrb[2].mxu0 %v1593_v48  ;;  %v1199_v16 = vpack.c.bf16 %v510_v12, %v509_v11  ;;  %v1273_v11 = vpack.c.bf16 %v578_v62, %v577_v61  ;;  %v547_v12 = vld [vmem:[%s2179_s3 + $0x210] sm:$0xff]  ;;  %v556_v62 = vld [vmem:[%s2179_s3 + $0x258] sm:$0xff] }
  0x46   :  { %467 = vmatmul.mubr.f32.vlgmr.msra.gmra.mrb[2].mxu1 %v1593_v48  ;;  %1178 = vmatpush3.bf16.msra.mxu0 %v1177_v18  ;;  %v517_v48 = vld [vmem:[%s2179_s3 + $0x120] sm:$0xff]  ;;  %v555_v61 = vld [vmem:[%s2179_s3 + $0x250] sm:$0xff] }
  0x47   :  { %1210 = vmatpush3.bf16.msra.mxu1 %v1209_v19  ;;  %1180 = vmatprep.subr.bf16.mxu0 %v1179_v22  ;;  %v1217_v42 = vpack.c.bf16 %v518_v36, %v517_v48  ;;  %v493_v18 = vld [vmem:[%s2179_s3 + $0x60] sm:$0xff]  ;;  %v494_v19 = vld [vmem:[%s2179_s3 + $0x68] sm:$0xff] }
  0x48   :  { %1212 = vmatprep.subr.bf16.mxu1 %v1211_v23  ;;  %v1201_v21 = vpack.c.bf16 %v494_v19, %v493_v18  ;;  %v526_v22 = vld [vmem:[%s2179_s3 + $0x168] sm:$0xff]  ;;  %v561_v48 = vld [vmem:[%s2179_s3 + $0x280] sm:$0xff] }
  0x49   :  { %v1233_v23 = vpack.c.bf16 %v526_v22, %v525_v20  ;;  %v562_v36 = vld [vmem:[%s2179_s3 + $0x288] sm:$0xff]  ;;  %v597_v19 = vld [vmem:[%s2179_s3 + $0x3a0] sm:$0xff] }
  0x4a   :  { %1182 = vmatpush3.bf16.msra.mxu0 %v1181_v30  ;;  %v496_v30 = vld [vmem:[%s2179_s3 + $0x78] sm:$0xff]  ;;  %v1239_v38 = vpack.c.bf16 %v562_v36, %v561_v48  ;;  %v566_v18 = vld [vmem:[%s2179_s3 + $0x2a8] sm:$0xff] }
  0x4b   :  { %1214 = vmatpush3.bf16.msra.mxu1 %v1213_v31  ;;  %1184 = vmatprep.subr.bf16.mxu0 %v1183_v34  ;;  %v1235_v31 = vpack.c.bf16 %v544_v28, %v543_v26  ;;  %v1205_v32 = vpack.c.bf16 %v496_v30, %v495_v29  ;;  %v528_v34 = vld [vmem:[%s2179_s3 + $0x178] sm:$0xff]  ;;  %v598_v20 = vld [vmem:[%s2179_s3 + $0x3a8] sm:$0xff]  ;;  %v567_v29 = vld [vmem:[%s2179_s3 + $0x2b0] sm:$0xff] }
  0x4c   :  { %1216 = vmatprep.subr.bf16.mxu1 %v1215_v35  ;;  %v1237_v35 = vpack.c.bf16 %v528_v34, %v527_v33  ;;  %v1279_v26 = vpack.c.bf16 %v598_v20, %v597_v19  ;;  %v582_v28 = vld [vmem:[%s2179_s3 + $0x328] sm:$0xff]  ;;  %v568_v30 = vld [vmem:[%s2179_s3 + $0x2b8] sm:$0xff] }
  0x4d   :  { %v552_v48 = vld [vmem:[%s2179_s3 + $0x238] sm:$0xff]  ;;  %v1251_v36 = vpack.c.bf16 %v568_v30, %v567_v29  ;;  %v591_v30 = vld [vmem:[%s2179_s3 + $0x370] sm:$0xff] }
  0x4e   :  { %1186 = vmatpush3.bf16.msra.mxu0 %v1185_v41  ;;  %v149_v41 = vlaneseq  ;;  %v576_v20 = vld [vmem:[%s2179_s3 + $0x2f8] sm:$0xff] }
  0x4f   :  { %1218 = vmatpush3.bf16.msra.mxu1 %v1217_v42  ;;  %1188 = vmatprep.subr.bf16.mxu0 %v1187_v45  ;;  %v1968_v45 = vld [vmem:[%s2178_s2] sm:$0xff]  ;;  %v560_v29 = vld [vmem:[%s2179_s3 + $0x278] sm:$0xff] }
  0x50   :  { %1220 = vmatprep.subr.bf16.mxu1 %v1219_v46  ;;  %v1961_v42 = vshrl.u32 %v149_v41, 7  ;;  %v570_v41 = vld [vmem:[%s2179_s3 + $0x2c8] sm:$0xff] }
  0x52   :  { %1190 = vmatpush3.bf16.msra.mxu0 %v1189_v54  ;;  %v151_v43 = vsub.s32 0, %v1961_v42  ;;  %v159_v44 = vsub.s32 2, %v1961_v42  ;;  %v155_v46 = vsub.s32 1, %v1961_v42  ;;  %v163_v47 = vsub.s32 3, %v1961_v42 }
  0x53   :  { %1222 = vmatpush3.bf16.msra.mxu1 %v1221_v55  ;;  %1192 = vmatprep.subr.bf16.mxu0 %v1191_v58  ;;  %v545_v55 = vld [vmem:[%s2179_s3 + $0x200] sm:$0xff]  ;;  %v179_v19 = vsub.s32 7, %v1961_v42 }
  0x54   :  { %1224 = vmatprep.subr.bf16.mxu1 %v1223_v59  ;;  %v152_v49 = vrot.slane %v1968_v45, %v151_v43  ;;  %v160_v50 = vrot.slane %v1968_v45, %v159_v44  ;;  %v156_v51 = vrot.slane %v1968_v45, %v155_v46  ;;  %v164_v52 = vrot.slane %v1968_v45, %v163_v47  ;;  %v601_v43 = vld [vmem:[%s2179_s3 + $0x3c0] sm:$0xff]  ;;  %v602_v44 = vld [vmem:[%s2179_s3 + $0x3c8] sm:$0xff] }
  0x55   :  { %v1241_v10 = vpack.c.bf16 %v546_v56, %v545_v55  ;;  %v571_v55 = vld [vmem:[%s2179_s3 + $0x2d0] sm:$0xff]  ;;  %v572_v56 = vld [vmem:[%s2179_s3 + $0x2d8] sm:$0xff] }
  0x56   :  { %1194 = vmatpush3.bf16.msra.mxu0 %v1193_v2  ;;  %v564_v2 = vld [vmem:[%s2179_s3 + $0x298] sm:$0xff] }
  0x57   :  { %1226 = vmatpush3.bf16.msra.mxu1 %v1225_v3  ;;  %1196 = vmatprep.subr.bf16.mxu0 %v1195_v7  ;;  %v595_v3 = vld [vmem:[%s2179_s3 + $0x390] sm:$0xff]  ;;  %v1243_v14 = vpack.c.bf16 %v564_v2, %v563_v63  ;;  %v1259_v63 = vpack.c.bf16 %v572_v56, %v571_v55  ;;  %v588_v2 = vld [vmem:[%s2179_s3 + $0x358] sm:$0xff] }
  0x58   :  { %1228 = vmatprep.subr.bf16.mxu1 %v1227_v8 }
  0x5a   :  { %1198 = vmatpush3.bf16.msra.mxu0 %v1197_v15  ;;  %v1275_v15 = vpack.c.bf16 %v596_v4, %v595_v3  ;;  %v573_v3 = vld [vmem:[%s2179_s3 + $0x2e0] sm:$0xff]  ;;  %v574_v4 = vld [vmem:[%s2179_s3 + $0x2e8] sm:$0xff] }
  0x5b   :  { %1230 = vmatpush3.bf16.msra.mxu1 %v1229_v6  ;;  %1200 = vmatprep.subr.bf16.mxu0 %v1199_v16  ;;  %v579_v6 = vld [vmem:[%s2179_s3 + $0x310] sm:$0xff]  ;;  %v580_v16 = vld [vmem:[%s2179_s3 + $0x318] sm:$0xff] }
  0x5c   :  { %1232 = vmatprep.subr.bf16.mxu1 %v1231_v17  ;;  %v565_v17 = vld [vmem:[%s2179_s3 + $0x2a0] sm:$0xff]  ;;  %v1277_v22 = vpack.c.bf16 %v580_v16, %v579_v6  ;;  %v590_v16 = vld [vmem:[%s2179_s3 + $0x368] sm:$0xff] }
  0x5d   :  { %v1247_v25 = vpack.c.bf16 %v566_v18, %v565_v17  ;;  %v589_v6 = vld [vmem:[%s2179_s3 + $0x360] sm:$0xff]  ;;  %v575_v17 = vld [vmem:[%s2179_s3 + $0x2f0] sm:$0xff]  ;;  %v171_v18 = vsub.s32 5, %v1961_v42 }
  0x5e   :  { %1202 = vmatpush3.bf16.msra.mxu0 %v1201_v21  ;;  %v1245_v21 = vpack.c.bf16 %v548_v13, %v547_v12  ;;  %v558_v12 = vld [vmem:[%s2179_s3 + $0x268] sm:$0xff]  ;;  %v1263_v13 = vpack.c.bf16 %v574_v4, %v573_v3 }
  0x5f   :  { %1234 = vmatpush3.bf16.msra.mxu1 %v1233_v23  ;;  %1204 = vmatprep.subr.bf16.mxu0 %v1203_v27  ;;  %v549_v23 = vld [vmem:[%s2179_s3 + $0x220] sm:$0xff] }
  0x60   :  { %1236 = vmatprep.subr.bf16.mxu1 %v1235_v31  ;;  %v581_v27 = vld [vmem:[%s2179_s3 + $0x320] sm:$0xff]  ;;  %v599_v31 = vld [vmem:[%s2179_s3 + $0x3b0] sm:$0xff]  ;;  %v1249_v33 = vpack.c.bf16 %v550_v24, %v549_v23 }
  0x61   :  { %v1281_v34 = vpack.c.bf16 %v582_v28, %v581_v27  ;;  %v1267_v27 = vpack.c.bf16 %v576_v20, %v575_v17 }
  0x62   :  { %1206 = vmatpush3.bf16.msra.mxu0 %v1205_v32  ;;  %v600_v32 = vld [vmem:[%s2179_s3 + $0x3b8] sm:$0xff] }
  0x63   :  { %1238 = vmatpush3.bf16.msra.mxu1 %v1237_v35  ;;  %1240 = vmatprep.subr.bf16.mxu0 %v1239_v38  ;;  %v551_v35 = vld [vmem:[%s2179_s3 + $0x230] sm:$0xff]  ;;  %v1283_v37 = vpack.c.bf16 %v600_v32, %v599_v31  ;;  %v592_v31 = vld [vmem:[%s2179_s3 + $0x378] sm:$0xff]  ;;  %v172_v32 = vrot.slane %v1968_v45, %v171_v18 }
  0x64   :  { %1272 = vmatprep.subr.bf16.mxu1 %v1271_v40  ;;  %v583_v38 = vld [vmem:[%s2179_s3 + $0x330] sm:$0xff]  ;;  %v569_v40 = vld [vmem:[%s2179_s3 + $0x2c0] sm:$0xff]  ;;  %v1253_v46 = vpack.c.bf16 %v552_v48, %v551_v35 }
  0x65   :  { %v1285_v47 = vpack.c.bf16 %v584_v39, %v583_v38 }
  0xf8   :  { %v255_v53 = vpop.f32.mrb[0].mxu0 }
  0xf9   :  { %v326_v54 = vpop.f32.mrb[0].mxu1  ;;  %v256_v57 = vadd.f32 %v255_v53, %v152_v49  ;;  %v257_v59 = vpop.f32.mrb[1].mxu0  ;;  %v553_v49 = vld [vmem:[%s2179_s3 + $0x240] sm:$0xff] }
  0xfa   :  { %v327_v58 = vadd.f32 %v326_v54, %v160_v50  ;;  %v328_v60 = vpop.f32.mrb[1].mxu1  ;;  %v258_v0 = vadd.f32 %v257_v59, %v156_v51  ;;  %v554_v50 = vld [vmem:[%s2179_s3 + $0x248] sm:$0xff]  ;;  %v1255_v51 = vpack.c.bf16 %v570_v41, %v569_v40  ;;  %v585_v53 = vld [vmem:[%s2179_s3 + $0x340] sm:$0xff] }
  0xfb   :  { %v329_v1 = vadd.f32 %v328_v60, %v164_v52  ;;  %v473_v5 = vmax.f32 %v256_v57, 0.0  ;;  %v1287_v52 = vpack.c.bf16 %v602_v44, %v601_v43  ;;  %v586_v54 = vld [vmem:[%s2179_s3 + $0x348] sm:$0xff]  ;;  %v603_v57 = vld [vmem:[%s2179_s3 + $0x3d0] sm:$0xff]  ;;  %v1257_v59 = vpack.c.bf16 %v554_v50, %v553_v49 }
  0xfc   :  { %v475_v7 = vmax.f32 %v327_v58, 0.0  ;;  %v474_v8 = vmax.f32 %v258_v0, 0.0  ;;  %v604_v58 = vld [vmem:[%s2179_s3 + $0x3d8] sm:$0xff]  ;;  %v1289_v60 = vpack.c.bf16 %v586_v54, %v585_v53 }
  0xfd   :  { %v476_v9 = vmax.f32 %v329_v1, 0.0  ;;  %v1291_v0 = vpack.c.bf16 %v604_v58, %v603_v57  ;;  %v587_v1 = vld [vmem:[%s2179_s3 + $0x350] sm:$0xff] }
  0xfe   :  { %673 = vmatprep.mubr.f32.mxu0 %v474_v8  ;;  %v1261_v8 = vpack.c.bf16 %v556_v62, %v555_v61 }
  0xff   :  { %743 = vmatprep.mubr.f32.mxu1 %v476_v9  ;;  %674 = vmatmul.mubr.f32.vlgmr.msra.gmra.mrb[4].mxu0 %v473_v5  ;;  %v605_v5 = vld [vmem:[%s2179_s3 + $0x3e0] sm:$0xff]  ;;  %v1293_v9 = vpack.c.bf16 %v588_v2, %v587_v1 }
 0x100   :  { %744 = vmatmul.mubr.f32.vlgmr.msra.gmra.mrb[4].mxu1 %v475_v7  ;;  %1242 = vmatpush3.bf16.msra.mxu0 %v1241_v10  ;;  %v606_v7 = vld [vmem:[%s2179_s3 + $0x3e8] sm:$0xff]  ;;  %v167_v10 = vsub.s32 4, %v1961_v42 }
 0x101   :  { %1274 = vmatpush3.bf16.msra.mxu1 %v1273_v11  ;;  %1244 = vmatprep.subr.bf16.mxu0 %v1243_v14  ;;  %v557_v11 = vld [vmem:[%s2179_s3 + $0x260] sm:$0xff]  ;;  %v1295_v14 = vpack.c.bf16 %v606_v7, %v605_v5 }
 0x102   :  { %1276 = vmatprep.subr.bf16.mxu1 %v1275_v15  ;;  %v175_v15 = vsub.s32 6, %v1961_v42  ;;  %v168_v23 = vrot.slane %v1968_v45, %v167_v10  ;;  %v1265_v24 = vpack.c.bf16 %v558_v12, %v557_v11  ;;  %v559_v42 = vld [vmem:[%s2179_s3 + $0x270] sm:$0xff] }
 0x103   :  { %v1269_v48 = vpack.c.bf16 %v560_v29, %v559_v42 }
 0x104   :  { %1246 = vmatpush3.bf16.msra.mxu0 %v1245_v21  ;;  %v607_v21 = vld [vmem:[%s2179_s3 + $0x3f0] sm:$0xff] }
 0x105   :  { %1278 = vmatpush3.bf16.msra.mxu1 %v1277_v22  ;;  %1248 = vmatprep.subr.bf16.mxu0 %v1247_v25  ;;  %v608_v22 = vld [vmem:[%s2179_s3 + $0x3f8] sm:$0xff]  ;;  %v1297_v25 = vpack.c.bf16 %v590_v16, %v589_v6 }
 0x106   :  { %1280 = vmatprep.subr.bf16.mxu1 %v1279_v26  ;;  %v176_v26 = vrot.slane %v1968_v45, %v175_v15  ;;  %v1299_v28 = vpack.c.bf16 %v608_v22, %v607_v21 }
 0x108   :  { %1250 = vmatpush3.bf16.msra.mxu0 %v1249_v33  ;;  %v180_v33 = vrot.slane %v1968_v45, %v179_v19 }
 0x109   :  { %1282 = vmatpush3.bf16.msra.mxu1 %v1281_v34  ;;  %1252 = vmatprep.subr.bf16.mxu0 %v1251_v36  ;;  %v1301_v36 = vpack.c.bf16 %v592_v31, %v591_v30 }
 0x10a   :  { %1284 = vmatprep.subr.bf16.mxu1 %v1283_v37 }
 0x10c   :  { %1254 = vmatpush3.bf16.msra.mxu0 %v1253_v46 }
 0x10d   :  { %1286 = vmatpush3.bf16.msra.mxu1 %v1285_v47  ;;  %1256 = vmatprep.subr.bf16.mxu0 %v1255_v51 }
 0x10e   :  { %1288 = vmatprep.subr.bf16.mxu1 %v1287_v52 }
 0x110   :  { %1258 = vmatpush3.bf16.msra.mxu0 %v1257_v59 }
 0x111   :  { %1290 = vmatpush3.bf16.msra.mxu1 %v1289_v60  ;;  %1260 = vmatprep.subr.bf16.mxu0 %v1259_v63 }
 0x112   :  { %1292 = vmatprep.subr.bf16.mxu1 %v1291_v0 }
 0x114   :  { %1262 = vmatpush3.bf16.msra.mxu0 %v1261_v8 }
 0x115   :  { %1294 = vmatpush3.bf16.msra.mxu1 %v1293_v9  ;;  %1264 = vmatprep.subr.bf16.mxu0 %v1263_v13 }
 0x116   :  { %1296 = vmatprep.subr.bf16.mxu1 %v1295_v14 }
 0x118   :  { %v397_v34 = vpop.f32.mrb[2].mxu0  ;;  %1266 = vmatpush3.bf16.msra.mxu0 %v1265_v24 }
 0x119   :  { %v468_v35 = vpop.f32.mrb[2].mxu1  ;;  %1298 = vmatpush3.bf16.msra.mxu1 %v1297_v25  ;;  %v398_v37 = vadd.f32 %v397_v34, %v168_v23  ;;  %v399_v39 = vpop.f32.mrb[3].mxu0  ;;  %1268 = vmatprep.subr.bf16.mxu0 %v1267_v27 }
 0x11a   :  { %v469_v38 = vadd.f32 %v468_v35, %v176_v26  ;;  %v470_v40 = vpop.f32.mrb[3].mxu1  ;;  %1300 = vmatprep.subr.bf16.mxu1 %v1299_v28  ;;  %v400_v41 = vadd.f32 %v399_v39, %v172_v32 }
 0x11b   :  { %v471_v43 = vadd.f32 %v470_v40, %v180_v33  ;;  %v477_v45 = vmax.f32 %v398_v37, 0.0 }
 0x11c   :  { %v479_v44 = vmax.f32 %v469_v38, 0.0  ;;  %v478_v46 = vmax.f32 %v400_v41, 0.0  ;;  %1270 = vmatpush3.bf16.msra.mxu0 %v1269_v48 }
 0x11d   :  { %v480_v47 = vmax.f32 %v471_v43, 0.0  ;;  %1302 = vmatpush3.bf16.msra.mxu1 %v1301_v36 }
 0x11e   :  { %813 = vmatprep.mubr.f32.mxu0 %v478_v46 }
 0x11f   :  { %883 = vmatprep.mubr.f32.mxu1 %v480_v47  ;;  %814 = vmatmul.mubr.f32.vlgmr.msra.gmra.mrb[6].mxu0 %v477_v45 }
 0x120   :  { %884 = vmatmul.mubr.f32.vlgmr.msra.gmra.mrb[6].mxu1 %v479_v44 }
 0x1d2   :  { %v939_v49 = vpop.f32.mrb[4].mxu0 }
 0x1d3   :  { %v974_v50 = vpop.f32.mrb[4].mxu1  ;;  %v940_v51 = vpop.f32.mrb[5].mxu0 }
 0x1d4   :  { %v975_v52 = vpop.f32.mrb[5].mxu1  ;;  %v941_v53 = vadd.f32 %v940_v51, %v939_v49 }
 0x1d5   :  { %v976_v54 = vadd.f32 %v975_v52, %v974_v50 }
 0x1d7   :  { %v746_v55 = vadd.f32 %v976_v54, %v941_v53 }
 0x1f2   :  { %v1009_v56 = vpop.f32.mrb[6].mxu0 }
 0x1f3   :  { %v1044_v57 = vpop.f32.mrb[6].mxu1  ;;  %v1010_v58 = vpop.f32.mrb[7].mxu0 }
 0x1f4   :  { %v1045_v59 = vpop.f32.mrb[7].mxu1  ;;  %v1011_v60 = vadd.f32 %v1010_v58, %v1009_v56 }
 0x1f5   :  { %v1046_v61 = vadd.f32 %v1045_v59, %v1044_v57 }
 0x1f6   :  { %v816_v62 = vadd.f32 %v1011_v60, %v746_v55 }
 0x1f8   :  { %v886_v63 = vadd.f32 %v1046_v61, %v816_v62 }
 0x1fa   :  { %890 = vst.msk [vmem:[#allocation2] sm:$0xff] %vm889_vm0, %v886_v63 }
 0x1fb   :  { %895 = vsyncadd [#allocation3], 112  ;;  %s1332_s3 = smov [#allocation2]  }
 0x1fc   :  { %s896_s10 = sshll.u32 %s1332_s3, 4  ;;  %s897_s10 = int_to_ptr.vmem [resolvable:$true] %s896_s10 }
 0x1fd   :  { %s1307_s11 = scalar_lea.vmem %s897_s10, 16  ;;  %s1311_s12 = scalar_lea.vmem %s897_s10, 128 }
 0x1fe   :  { %p1308_p0 = scmp.ne.s32.totalorder %s897_s10, %s1307_s11  ;;  %p1312_p1 = scmp.lt.s32.totalorder %s897_s10, %s897_s10 }
 0x1ff   :  { %p1313_p2 = scmp.lt.s32.totalorder %s1311_s12, %s1307_s11 }
 0x201   :  { %p1314_p3 = por %p1313_p2, %p1312_p1 }
 0x203   :  { %p1315_p4 = pnand %p1314_p3, %p1308_p0 }
 0x205   :  { %1318 = shalt.err (!%p1315_p4)
}
 0x206   :  { %s1319_s15 = scalar_lea.hbm %s2180_s4, 16 }
 0x207   :  { %p1320_p5 = scmp.ne.s32.totalorder %s2180_s4, %s1319_s15  ;;  %p1323_p6 = scmp.lt.u32.totalorder %s1319_s15, %s2180_s4 }
 0x209   :  { %p1325_p7 = pnand %p1323_p6, %p1320_p5 }
 0x20b   :  { %1328 = shalt.err (!%p1325_p7)
}
 0x20c   :  { %s1333_s0 = smov 16   ;;  %s1334_s19 = smov 1  }
 0x20d   :  { %902 = dma.vmem_to_hbm [thread:$0]  %s897_s10, 16, %s2180_s4, [#allocation3], %s1333_s0, %s1333_s0, %s1334_s19  }
 0x20e   :  { %1329 = dma.done.wait [#allocation3], 128  }
 0x20f   :  { %1330 = vsyncadd [#allocation3], 4294967168 }
 0x210   :  { %906 = vsyncpa [#allocation3], 1 }

</bundles_post_ra>
